<compile_context>
chip_gen: v5e
topology: v5e:2x2
jax: 0.10.0
libtpu: 0.0.40
codegen_flags: <defaults>
</compile_context>

<pallas_src>
import jax
import jax.numpy as jnp
from jax.experimental import pallas as pl
from jax.experimental.pallas import tpu as pltpu


_LANE_WIDTH = 1024          # 8 sublanes x 128 lanes -> unmasked, lane-dense vst
_MAX_BLOCK_ROWS = 512       # (512, 1024) f32 block = 2 MiB
_VMEM_LIMIT = 32 * 1024 * 1024


def _stats_kernel(x_ref, max_ref, sum_ref):
    """Pass 1: online global max + rescaled exp-sum (outputs stay resident)."""
    i = pl.program_id(0)

    @pl.when(i == 0)
    def _init():
        max_ref[...] = jnp.full_like(max_ref, jnp.finfo(jnp.float32).min)
        sum_ref[...] = jnp.zeros_like(sum_ref)

    x = x_ref[...].astype(jnp.float32)
    m_old = max_ref[...]                           # (1, 1)
    m_new = jnp.maximum(m_old, jnp.max(x))         # (1, 1)
    # Rescale previously accumulated sum, then add this tile's contribution.
    sum_ref[...] = sum_ref[...] * jnp.exp(m_old - m_new) + jnp.sum(
        jnp.exp(x - m_new))
    max_ref[...] = m_new


def _normalize_kernel(stats_ref, x_ref, o_ref):
    """Pass 2: out = exp(x - global_max) * inv_global_sum (pure streaming)."""
    x = x_ref[...].astype(jnp.float32)
    g_max = stats_ref[0]      # SMEM scalar (global max)
    inv_sum = stats_ref[1]    # SMEM scalar (precomputed exact reciprocal)
    o_ref[...] = (jnp.exp(x - g_max) * inv_sum).astype(o_ref.dtype)


def softmax_stable(x):
    """Global numerically-stable softmax, matching SoftmaxStable.forward."""
    orig_shape = x.shape
    orig_dtype = x.dtype
    total = x.size

    # --- lane-dense 2-D padded view -----------------------------------------
    bn = _LANE_WIDTH
    rows_needed = pl.cdiv(total, bn)
    bm = min(_MAX_BLOCK_ROWS, rows_needed)       # full dim if small, else 512 (mult of 8)
    rows = pl.cdiv(rows_needed, bm) * bm
    padded_total = rows * bn

    x_flat = x.reshape(-1)
    pad = padded_total - total
    if pad > 0:
        # finfo.min pad -> exp(pad - max) == 0, so the global sum is exact.
        pad_val = jnp.finfo(orig_dtype).min
        x_flat = jnp.concatenate(
            [x_flat, jnp.full((pad,), pad_val, dtype=orig_dtype)])
    x2d = x_flat.reshape(rows, bn)

    num_blocks = rows // bm

    # --- pass 1: global max / exp-sum (reduction over the grid axis) --------
    g_max, g_sum = pl.pallas_call(
        _stats_kernel,
        out_shape=(jax.ShapeDtypeStruct((1, 1), jnp.float32),
                   jax.ShapeDtypeStruct((1, 1), jnp.float32)),
        grid=(num_blocks,),
        in_specs=[pl.BlockSpec((bm, bn), lambda i: (i, 0))],
        out_specs=(pl.BlockSpec((1, 1), lambda i: (0, 0)),
                   pl.BlockSpec((1, 1), lambda i: (0, 0))),
        compiler_params=pltpu.CompilerParams(
            dimension_semantics=("arbitrary",),
            vmem_limit_bytes=_VMEM_LIMIT),
    )(x2d)

    # Exact reciprocal computed once (keeps tight tolerances), packed for SMEM.
    inv_sum = 1.0 / g_sum[0, 0]
    stats = jnp.stack([g_max[0, 0], inv_sum]).astype(jnp.float32)   # (2,)

    # --- pass 2: normalize (embarrassingly parallel over the grid axis) -----
    out2d = pl.pallas_call(
        _normalize_kernel,
        out_shape=jax.ShapeDtypeStruct((rows, bn), orig_dtype),
        grid=(num_blocks,),
        in_specs=[
            pl.BlockSpec(memory_space=pltpu.MemorySpace.SMEM),
            pl.BlockSpec((bm, bn), lambda i: (i, 0)),
        ],
        out_specs=pl.BlockSpec((bm, bn), lambda i: (i, 0)),
        compiler_params=pltpu.CompilerParams(
            dimension_semantics=("parallel",),
            vmem_limit_bytes=_VMEM_LIMIT),
    )(stats, x2d)

    return out2d.reshape(-1)[:total].reshape(orig_shape)


def softmax_stable_ref(x):
    # Pure-JAX reference mirroring the PyTorch module exactly.
    x_max = jnp.max(x)
    x_exp = jnp.exp(x - x_max)
    return x_exp / jnp.sum(x_exp)


if __name__ == "__main__":
    key = jax.random.PRNGKey(0)
    # Small NCHW-style input consistent with typical module usage.
    x = jax.random.normal(key, (2, 4, 16, 16), dtype=jnp.float32) * 3.0

    out = softmax_stable(x)
    out = jax.block_until_ready(out)

    ref = softmax_stable_ref(x)
    assert out.shape == x.shape and out.dtype == x.dtype
    assert jnp.allclose(out, ref, atol=1e-6, rtol=1e-5), "mismatch vs reference"
    # Global softmax sums to 1 over the whole tensor.
    assert jnp.allclose(jnp.sum(out), 1.0, atol=1e-5)

    print("KERNEL_OK")
</pallas_src>

<mosaic_0001>
module attributes {stable_mosaic.version = 11 : i64} {
  func.func @_stats_kernel(%arg0: i32, %arg1: memref<2x1024xf32, #tpu.memory_space<vmem>>, %arg2: memref<1x1xf32, #tpu.memory_space<vmem>>, %arg3: memref<1x1xf32, #tpu.memory_space<vmem>>) attributes {dimension_semantics = [#tpu.dimension_semantics<arbitrary>], iteration_bounds = array<i64: 1>, scalar_prefetch = 0 : i64, scratch_operands = 0 : i64, tpu.core_type = #tpu.core_type<tc>, window_params = [{transform_indices = @transform_0, window_bounds = array<i64: 2, 1024>}, {pipeline_mode = #tpu.pipeline_mode<synchronous>, transform_indices = @transform_1, window_bounds = array<i64: 1, 1>}, {pipeline_mode = #tpu.pipeline_mode<synchronous>, transform_indices = @transform_2, window_bounds = array<i64: 1, 1>}]} {
    %c0_i32 = arith.constant 0 : i32
    %0 = arith.cmpi eq, %arg0, %c0_i32 : i32
    %1 = arith.extui %0 : i1 to i32
    %c0_i32_0 = arith.constant 0 : i32
    %2 = arith.cmpi ne, %1, %c0_i32_0 : i32
    scf.if %2 {
      %cst_11 = arith.constant -3.40282347E+38 : f32
      %26 = vector.broadcast %cst_11 : f32 to vector<1x1xf32>
      %c0_12 = arith.constant 0 : index
      %c0_13 = arith.constant 0 : index
      %27 = vector.load %arg2[%c0_12, %c0_13] : memref<1x1xf32, #tpu.memory_space<vmem>>, vector<1x1xf32>
      tpu.vector_store %arg2[%c0_12, %c0_13], %26 {strides = array<i32>} : memref<1x1xf32, #tpu.memory_space<vmem>>, vector<1x1xf32>,
      %cst_14 = arith.constant 0.000000e+00 : f32
      %28 = vector.broadcast %cst_14 : f32 to vector<1x1xf32>
      %c0_15 = arith.constant 0 : index
      %c0_16 = arith.constant 0 : index
      %29 = vector.load %arg3[%c0_15, %c0_16] : memref<1x1xf32, #tpu.memory_space<vmem>>, vector<1x1xf32>
      tpu.vector_store %arg3[%c0_15, %c0_16], %28 {strides = array<i32>} : memref<1x1xf32, #tpu.memory_space<vmem>>, vector<1x1xf32>,
    } else {
    }
    %c0 = arith.constant 0 : index
    %c0_1 = arith.constant 0 : index
    %3 = vector.load %arg1[%c0, %c0_1] : memref<2x1024xf32, #tpu.memory_space<vmem>>, vector<2x1024xf32>
    %c0_2 = arith.constant 0 : index
    %c0_3 = arith.constant 0 : index
    %4 = vector.load %arg2[%c0_2, %c0_3] : memref<1x1xf32, #tpu.memory_space<vmem>>, vector<1x1xf32>
    %5 = vector.shape_cast %3 : vector<2x1024xf32> to vector<1x2x1024xf32>
    %cst = arith.constant dense<0xFF800000> : vector<1xf32>
    %6 = vector.multi_reduction <maximumf>, %5, %cst [1, 2] : vector<1x2x1024xf32> to vector<1xf32>
    %7 = vector.shape_cast %6 : vector<1xf32> to vector<1x1x1xf32>
    %8 = vector.extract %7[0, 0, 0] : f32 from vector<1x1x1xf32>
    %9 = vector.broadcast %8 : f32 to vector<1x1xf32>
    %10 = arith.maximumf %4, %9 : vector<1x1xf32>
    %c0_4 = arith.constant 0 : index
    %c0_5 = arith.constant 0 : index
    %11 = vector.load %arg3[%c0_4, %c0_5] : memref<1x1xf32, #tpu.memory_space<vmem>>, vector<1x1xf32>
    %12 = arith.subf %4, %10 : vector<1x1xf32>
    %13 = math.exp %12 : vector<1x1xf32>
    %14 = arith.mulf %11, %13 : vector<1x1xf32>
    %15 = vector.broadcast %10 : vector<1x1xf32> to vector<2x1024xf32>
    %16 = arith.subf %3, %15 : vector<2x1024xf32>
    %17 = math.exp %16 : vector<2x1024xf32>
    %18 = vector.shape_cast %17 : vector<2x1024xf32> to vector<1x2x1024xf32>
    %cst_6 = arith.constant dense<0.000000e+00> : vector<1xf32>
    %19 = vector.multi_reduction <add>, %18, %cst_6 [1, 2] : vector<1x2x1024xf32> to vector<1xf32>
    %20 = vector.shape_cast %19 : vector<1xf32> to vector<1x1x1xf32>
    %21 = vector.extract %20[0, 0, 0] : f32 from vector<1x1x1xf32>
    %22 = vector.broadcast %21 : f32 to vector<1x1xf32>
    %23 = arith.addf %14, %22 : vector<1x1xf32>
    %c0_7 = arith.constant 0 : index
    %c0_8 = arith.constant 0 : index
    %24 = vector.load %arg3[%c0_7, %c0_8] : memref<1x1xf32, #tpu.memory_space<vmem>>, vector<1x1xf32>
    tpu.vector_store %arg3[%c0_7, %c0_8], %23 {strides = array<i32>} : memref<1x1xf32, #tpu.memory_space<vmem>>, vector<1x1xf32>,
    %c0_9 = arith.constant 0 : index
    %c0_10 = arith.constant 0 : index
    %25 = vector.load %arg2[%c0_9, %c0_10] : memref<1x1xf32, #tpu.memory_space<vmem>>, vector<1x1xf32>
    tpu.vector_store %arg2[%c0_9, %c0_10], %10 {strides = array<i32>} : memref<1x1xf32, #tpu.memory_space<vmem>>, vector<1x1xf32>,
    return
  }
  func.func @transform_0(%arg0: i32) -> (i32, i32) {
    %c0_i32 = arith.constant 0 : i32
    %c0_i32_0 = arith.constant 0 : i32
    return %arg0, %c0_i32 : i32, i32
  }
  func.func @transform_1(%arg0: i32) -> (i32, i32) {
    %c0_i32 = arith.constant 0 : i32
    %c0_i32_0 = arith.constant 0 : i32
    %c0_i32_1 = arith.constant 0 : i32
    return %c0_i32, %c0_i32_0 : i32, i32
  }
  func.func @transform_2(%arg0: i32) -> (i32, i32) {
    %c0_i32 = arith.constant 0 : i32
    %c0_i32_0 = arith.constant 0 : i32
    %c0_i32_1 = arith.constant 0 : i32
    return %c0_i32, %c0_i32_0 : i32, i32
  }
}

</mosaic_0001>

<bundles_post_ra>
// kernel: tpu_custom_call.1
= control target key start
LH: loop header
LB: loop body
LE: loop exit
PB: predicated region body
PF: predicated region fallthrough
CT: control target
= control target key end

     0   :  { %8 = vsyncpa [#allocation3], 0  ;;  %s329_s0 = inlined_call_operand.hbm [shape: f32[2,1024], index: 0, kind: input, shape index: {}]   ;;  %s330_s1 = inlined_call_operand.hbm [shape: f32[1,1], index: 1, kind: output, shape index: {0}]   ;;  %s331_s2 = inlined_call_operand.hbm [shape: f32[1,1], index: 2, kind: output, shape index: {1}]  }
   0x1   :  { %9 = vsyncpa [#allocation4], 0 }
   0x2   :  { %10 = vsyncpa [#allocation7], 0  ;;  %s16_s11 = sshll.u32 %s329_s0, 4  ;;  %s279_s12 = smov [#allocation2]   ;;  %s17_s11 = int_to_ptr.hbm [resolvable:$true] %s16_s11 }
   0x3   :  { %s18_s13 = sshll.u32 %s279_s12, 4  ;;  %s19_s13 = int_to_ptr.vmem [resolvable:$true] %s18_s13 }
   0x4   :  { %21 = dma.hbm_to_vmem [thread:$0]  %s17_s11, 256, %s19_s13, [#allocation3]  }
   0x5   :  { %273 = dma.done.wait [#allocation3], 256  }
   0x6   :  { %274 = vsyncadd [#allocation3], 4294967040  ;;  %v33_v0 = vld [vmem:[#allocation2] sm:$0xff]  ;;  %v34_v1 = vld [vmem:[#allocation2 + $0x8] sm:$0xff]  ;;  %vm57_vm0 = vcmask 1041408   ;;  %vm30_vm1 = vcmask 0  }
   0x7   :  { %38 = vst [vmem:[#allocation1] ss:$4 sm:$0xff] %v33_v0  ;;  %v280_v25 = vmov -3.4028235e+38   ;;  %v281_v33 = vmov 0   ;;  %v282_v34 = vmov 0.0  }
   0x8   :  { %40 = vst [vmem:[#allocation1 + $0x20] ss:$4 sm:$0xff] %v34_v1  ;;  %194 = vset.pattern.permute.xlu0 %v281_v33  ;;  %s158_s16 = sshll.u32 %s330_s1, 4  ;;  %s283_s17 = smov [#allocation5]   ;;  %s159_s16 = int_to_ptr.hbm [resolvable:$true] %s158_s16 }
   0x9   :  { %31 = vst.msk [vmem:[#allocation5] sm:$0x1] %vm30_vm1, %v280_v25  ;;  %s156_s18 = sshll.u32 %s283_s17, 4  ;;  %s284_s19 = smov [#allocation6]   ;;  %s157_s18 = int_to_ptr.vmem [resolvable:$true] %s156_s18 }
   0xa   :  { %32 = vst.msk [vmem:[#allocation6] sm:$0x1] %vm30_vm1, %v282_v34  ;;  %s167_s20 = sshll.u32 %s284_s19, 4  ;;  %s169_s22 = sshll.u32 %s331_s2, 4  ;;  %s168_s20 = int_to_ptr.vmem [resolvable:$true] %s167_s20  ;;  %s170_s22 = int_to_ptr.hbm [resolvable:$true] %s169_s22 }
   0xe   :  { %v41_v2 = vld.sshfl [vmem:[#allocation1] sm:$0xff pattern:$0x73625140]  ;;  %v42_v3 = vld.sshfl [vmem:[#allocation1 + $0x8] sm:$0xff pattern:$0x73625140] }
   0xf   :  { %v43_v4 = vld.sshfl [vmem:[#allocation1 + $0x10] sm:$0xff pattern:$0x73625140]  ;;  %v44_v5 = vld.sshfl [vmem:[#allocation1 + $0x18] sm:$0xff pattern:$0x73625140] }
  0x10   :  { %v45_v6 = vld.sshfl [vmem:[#allocation1 + $0x20] sm:$0xff pattern:$0x73625140]  ;;  %v46_v7 = vld.sshfl [vmem:[#allocation1 + $0x28] sm:$0xff pattern:$0x73625140] }
  0x11   :  { %v47_v8 = vld.sshfl [vmem:[#allocation1 + $0x30] sm:$0xff pattern:$0x73625140]  ;;  %v48_v9 = vld.sshfl [vmem:[#allocation1 + $0x38] sm:$0xff pattern:$0x73625140] }
  0x12   :  { %v58_v10 = vsel %vm57_vm0, %v41_v2, -inf  ;;  %v59_v11 = vsel %vm57_vm0, %v42_v3, -inf  ;;  %v60_v12 = vsel %vm57_vm0, %v43_v4, -inf  ;;  %v61_v13 = vsel %vm57_vm0, %v44_v5, -inf  ;;  %v35_v35 = vld [vmem:[#allocation5] sm:$0x1] }
  0x13   :  { %v62_v14 = vsel %vm57_vm0, %v45_v6, -inf  ;;  %v64_v15 = vsel %vm57_vm0, %v46_v7, -inf  ;;  %v66_v16 = vsel %vm57_vm0, %v47_v8, -inf  ;;  %v68_v17 = vsel %vm57_vm0, %v48_v9, -inf }
  0x14   :  { %v63_v18 = vmax.f32 %v58_v10, %v62_v14  ;;  %v65_v19 = vmax.f32 %v59_v11, %v64_v15  ;;  %v67_v20 = vmax.f32 %v60_v12, %v66_v16  ;;  %v69_v21 = vmax.f32 %v61_v13, %v68_v17  ;;  %v84_v15 = vld [vmem:[#allocation6] sm:$0x1] }
  0x16   :  { %v70_v22 = vmax.f32 %v63_v18, %v65_v19  ;;  %v71_v23 = vmax.f32 %v67_v20, %v69_v21 }
  0x18   :  { %v72_v24 = vmax.f32 %v70_v22, %v71_v23 }
  0x1a   :  { %73 = vmax.xlane.f32.xlu0 %v72_v24 }
  0x8d   :  { %v74_v26 = vpop.xlane.xlu0 %73 }
  0x8e   :  { %v75_v27 = vrot.slane %v74_v26, 4 }
  0x90   :  { %v76_v28 = vmax.f32 %v74_v26, %v75_v27 }
  0x92   :  { %v77_v29 = vrot.slane %v76_v28, 2 }
  0x94   :  { %v78_v30 = vmax.f32 %v76_v28, %v77_v29 }
  0x96   :  { %v79_v31 = vrot.slane %v78_v30, 1 }
  0x98   :  { %v80_v32 = vmax.f32 %v78_v30, %v79_v31 }
  0x9a   :  { %184 = vpush %v80_v32 }
  0xcb   :  { %s185_s0 = spop %184 }
  0xcc   :  { %v82_v36 = vstv %s185_s0 }
  0xcd   :  { %v83_v37 = vmax.f32 %v35_v35, %v82_v36 }
  0xcf   :  { %v85_v38 = vsub.f32 %v35_v35, %v83_v37  ;;  %150 = vst.msk [vmem:[#allocation5] sm:$0x1] %vm30_vm1, %v83_v37  ;;  %v90_v39 = vperm.slane %v83_v37, 0 }
  0xd0   :  { %161 = dma.vmem_to_hbm [thread:$0]  %s157_s18, 16, %s159_s16, [#allocation4]  }
  0xd1   :  { %92 = vperm.xlu0 %194, %v90_v39   ;;  %v86_v13 = vmul.f32 1.442695, %v85_v38 }
 0x143   :  { %v93_v40 = vpop.permute.xlu0 %92 }
 0x144   :  { %v95_v41 = vsub.f32 %v33_v0, %v93_v40  ;;  %v96_v42 = vsub.f32 %v34_v1, %v93_v40 }
 0x146   :  { %v97_v43 = vmul.f32 1.442695, %v95_v41  ;;  %v99_v44 = vmul.f32 1.442695, %v96_v42 }
 0x148   :  { %195 = vpow2.f32 %v97_v43 }
 0x149   :  { %197 = vpow2.f32 %v99_v44 }
 0x14a   :  { %199 = vpow2.f32 %v86_v13 }
 0x14e   :  { %v196_v45 = vpop.eup %195 }
 0x14f   :  { %v198_v46 = vpop.eup %197  ;;  %103 = vst [vmem:[#allocation1] ss:$4 sm:$0xff] %v196_v45 }
 0x150   :  { %105 = vst [vmem:[#allocation1 + $0x20] ss:$4 sm:$0xff] %v198_v46  ;;  %v200_v14 = vpop.eup %199 }
 0x151   :  { %v88_v16 = vmul.f32 %v200_v14, %v84_v15 }
 0x156   :  { %v106_v47 = vld.sshfl [vmem:[#allocation1] sm:$0xff pattern:$0x73625140]  ;;  %v107_v48 = vld.sshfl [vmem:[#allocation1 + $0x8] sm:$0xff pattern:$0x73625140] }
 0x157   :  { %v108_v49 = vld.sshfl [vmem:[#allocation1 + $0x10] sm:$0xff pattern:$0x73625140]  ;;  %v122_v50 = vsel %vm57_vm0, %v106_v47, 0.0  ;;  %v123_v51 = vsel %vm57_vm0, %v107_v48, 0.0 }
 0x158   :  { %v109_v52 = vld.sshfl [vmem:[#allocation1 + $0x18] sm:$0xff pattern:$0x73625140]  ;;  %v124_v53 = vadd.f32 %v123_v51, %v122_v50  ;;  %v125_v54 = vsel %vm57_vm0, %v108_v49, 0.0 }
 0x159   :  { %v110_v55 = vld.sshfl [vmem:[#allocation1 + $0x20] sm:$0xff pattern:$0x73625140]  ;;  %v127_v57 = vsel %vm57_vm0, %v109_v52, 0.0 }
 0x15a   :  { %v126_v56 = vadd.f32 %v125_v54, %v124_v53  ;;  %v111_v58 = vld.sshfl [vmem:[#allocation1 + $0x28] sm:$0xff pattern:$0x73625140]  ;;  %v129_v60 = vsel %vm57_vm0, %v110_v55, 0.0 }
 0x15b   :  { %v112_v61 = vld.sshfl [vmem:[#allocation1 + $0x30] sm:$0xff pattern:$0x73625140]  ;;  %v131_v63 = vsel %vm57_vm0, %v111_v58, 0.0 }
 0x15c   :  { %v128_v59 = vadd.f32 %v127_v57, %v126_v56  ;;  %v113_v0 = vld.sshfl [vmem:[#allocation1 + $0x38] sm:$0xff pattern:$0x73625140]  ;;  %v133_v2 = vsel %vm57_vm0, %v112_v61, 0.0 }
 0x15d   :  { %v135_v4 = vsel %vm57_vm0, %v113_v0, 0.0 }
 0x15e   :  { %v130_v62 = vadd.f32 %v129_v60, %v128_v59 }
 0x160   :  { %v132_v1 = vadd.f32 %v131_v63, %v130_v62 }
 0x162   :  { %v134_v3 = vadd.f32 %v133_v2, %v132_v1 }
 0x164   :  { %v136_v5 = vadd.f32 %v135_v4, %v134_v3 }
 0x166   :  { %137 = vadd.xlane.f32.xlu1 %v136_v5 }
 0x1d9   :  { %v138_v6 = vpop.xlane.xlu1 %137 }
 0x1da   :  { %v139_v7 = vrot.slane %v138_v6, 4 }
 0x1dc   :  { %v140_v8 = vadd.f32 %v139_v7, %v138_v6 }
 0x1de   :  { %v141_v9 = vrot.slane %v140_v8, 2 }
 0x1e0   :  { %v142_v10 = vadd.f32 %v141_v9, %v140_v8 }
 0x1e2   :  { %v143_v11 = vrot.slane %v142_v10, 1 }
 0x1e4   :  { %v144_v12 = vadd.f32 %v143_v11, %v142_v10 }
 0x1e6   :  { %186 = vpush %v144_v12 }
 0x217   :  { %s187_s23 = spop %186 }
 0x218   :  { %v146_v17 = vstv %s187_s23 }
 0x219   :  { %v147_v18 = vadd.f32 %v146_v17, %v88_v16 }
 0x21b   :  { %149 = vst.msk [vmem:[#allocation6] sm:$0x1] %vm30_vm1, %v147_v18 }
 0x21c   :  { %172 = dma.vmem_to_hbm [thread:$0]  %s168_s20, 16, %s170_s22, [#allocation7]  }
 0x21d   :  { %275 = dma.done.wait [#allocation4], 16  }
 0x21e   :  { %276 = vsyncadd [#allocation4], 4294967280 }
 0x21f   :  { %277 = dma.done.wait [#allocation7], 16  }
 0x220   :  { %278 = vsyncadd [#allocation7], 4294967280 }
 0x221   :  { %181 = vsyncpa [#allocation3], 1 }
 0x222   :  { %182 = vsyncpa [#allocation4], 1 }
 0x223   :  { %183 = vsyncpa [#allocation7], 1 }

</bundles_post_ra>
